<compile_context>
chip_gen: v6e
topology: v6e:2x2x1
jax: 0.10.0
libtpu: 0.0.40
codegen_flags: <defaults>
</compile_context>

<pallas_src>
import functools

import jax
import jax.numpy as jnp
from jax import lax
from jax.experimental import pallas as pl
from jax.experimental.pallas import tpu as pltpu


# ----------------------------------------------------------------------------
# Kernel 1: fused 2x-nearest-upsample + zero pad + 3x3 conv for one batch image,
# producing BOTH output row phases per step.  Also emits per-step column sums /
# sums-of-squares for the BatchNorm statistics.
# ----------------------------------------------------------------------------
def conv_up_kernel(x_ref, b_ref, y_ref, sum_ref, ssq_ref, xp_ref):
    # x_ref  : (1, H, Cin*W)          original-resolution rows, lanes = (ci, w)
    # b_ref  : (3, Cin*W, Cout*2*Wo)  per-row-tap folded weights (grid-constant)
    # y_ref  : (1, H, Cout*2*Wo)      conv rows; lanes ordered (co, phase a, qo)
    # sum_ref: (1, 1, Cout*2*Wo)      partial BN sums
    # ssq_ref: (1, 1, Cout*2*Wo)      partial BN sums of squares
    # xp_ref : VMEM scratch (H+2, Cin*W); rows 0 and H+1 are the zero halo
    h = x_ref.shape[1]
    cinw = x_ref.shape[2]

    zero_row = jnp.zeros((1, cinw), dtype=xp_ref.dtype)
    xp_ref[0:1, :] = zero_row
    xp_ref[h + 1:h + 2, :] = zero_row
    xp_ref[1:h + 1, :] = x_ref[0]

    # Three accumulating MXU matmuls, one per original-row tap (i-1, i, i+1).
    # Upsample, zero padding, both row phases and all 3x3 column taps live in B,
    # so there is no lane-axis concatenate and no per-phase grid axis.
    acc = jnp.dot(xp_ref[0:h, :], b_ref[0], preferred_element_type=jnp.float32)
    acc = acc + jnp.dot(xp_ref[1:h + 1, :], b_ref[1], preferred_element_type=jnp.float32)
    acc = acc + jnp.dot(xp_ref[2:h + 2, :], b_ref[2], preferred_element_type=jnp.float32)
    # NOTE: conv bias intentionally omitted -- it cancels exactly under the
    # train-mode BatchNorm that follows (batch mean shifts by the same amount).

    y_ref[0] = acc
    sum_ref[0] = jnp.sum(acc, axis=0, keepdims=True)
    ssq_ref[0] = jnp.sum(acc * acc, axis=0, keepdims=True)


# ----------------------------------------------------------------------------
# Kernel 2: BatchNorm (fused scale/shift) + ReLU, writing a contiguous NCHW
# buffer (declared (N, Cout, H, 2*Wo); row-major identical to (N, Cout, Ho, Wo)).
# ----------------------------------------------------------------------------
def bn_relu_nchw_kernel(y_ref, sc_ref, sh_ref, o_ref):
    # y_ref : (1, H, TC*2*Wo)  lanes ordered (co, a, qo) within the channel block
    # sc_ref: (1, TC*2*Wo)     scale = gamma / sqrt(var + eps), repeated over (a, qo)
    # sh_ref: (1, TC*2*Wo)     shift = beta - mean * scale
    # o_ref : (1, TC, H, 2*Wo) contiguous NCHW memory for TC channels
    tc = o_ref.shape[1]
    two_wo = o_ref.shape[3]

    z = jnp.maximum(y_ref[0] * sc_ref[...] + sh_ref[...], 0.0)   # (H, TC*2*Wo)
    # Each channel's (H, 2*Wo) slab is already the row-interleaved NCHW data
    # (index a*Wo+q in a row == output row 2i+a, col q): no permutation matmul.
    # TODO(synk): coalesce these 64-lane stores with a single pltpu.einshape
    # relayout + one dense (TC, H*2*Wo) store if it matters at larger shapes.
    for c in range(tc):                          # static unroll over the channel block
        o_ref[0, c] = z[:, c * two_wo:(c + 1) * two_wo]


# ----------------------------------------------------------------------------
# Wrapper-side constant construction.
# ----------------------------------------------------------------------------
def _phase_folded_weights(weight, w_in):
    """Fold 2x nearest upsample + zero pad + 3x3 taps into three per-row-tap
    matrices B[k]: (Cin*W, Cout*2*Wo), output-column order (co, phase a, qo)."""
    cout, cin = weight.shape[0], weight.shape[1]
    wo = 2 * w_in
    # rc3[k, a, dy] = 1 iff output-row-phase a's conv row-tap dy reads original row i+k-1.
    rc3 = jnp.array([[[1., 0., 0.], [0., 0., 0.]],
                     [[0., 1., 1.], [1., 1., 0.]],
                     [[0., 0., 0.], [0., 0., 1.]]], dtype=jnp.float32)      # (3, 2, 3)
    # cc[w, qo, dx] = 1 iff (output col qo, conv col-tap dx) reads original col w.
    p = jnp.arange(wo)[:, None] + jnp.arange(3)[None, :]                    # padded upsampled col
    valid = (p >= 1) & (p <= wo)
    src = (p - 1) // 2
    cc = (valid[None, :, :] & (src[None, :, :] == jnp.arange(w_in)[:, None, None]))
    cc = cc.astype(jnp.float32)                                             # (W, Wo, 3)
    b6 = jnp.einsum('kay,oiyx,wqx->kiwoaq', rc3, weight.astype(jnp.float32), cc)
    return b6.reshape(3, cin * w_in, cout * 2 * wo)


def _channel_block(cout, lane_unit):
    """Largest channel-block size tc dividing cout with tc*lane_unit a multiple of 128."""
    for tc in range(cout, 0, -1):
        if cout % tc == 0 and (tc * lane_unit) % 128 == 0:
            return tc
    return cout   # fallback: masked lanes, still correct


# ----------------------------------------------------------------------------
# up_conv forward.
# ----------------------------------------------------------------------------
def up_conv_forward(x_nchw, weight, bias, gamma, beta, eps=1e-5):
    """x: (N, Cin, H, W) f32, weight: (Cout, Cin, 3, 3).  Returns (N, Cout, 2H, 2W) f32."""
    del bias  # cancels exactly under the train-mode BatchNorm that follows the conv
    n, cin, h, w = x_nchw.shape
    cout = weight.shape[0]
    ho, wo = 2 * h, 2 * w
    cinw = cin * w
    cout2wo = cout * 2 * wo

    # --- small-tensor glue only (no full-size HBM passes) ----------------------
    x_rows = jnp.transpose(x_nchw, (0, 2, 1, 3)).reshape(n, h, cinw)     # (N, H, Cin*W)
    b_mat = _phase_folded_weights(weight, w)                             # (3, Cin*W, Cout*2*Wo)

    # --- kernel 1: fused upsample + pad + conv (both phases) + BN partial stats -
    y, psum, pssq = pl.pallas_call(
        conv_up_kernel,
        out_shape=(
            jax.ShapeDtypeStruct((n, h, cout2wo), jnp.float32),
            jax.ShapeDtypeStruct((n, 1, cout2wo), jnp.float32),
            jax.ShapeDtypeStruct((n, 1, cout2wo), jnp.float32),
        ),
        grid_spec=pltpu.PrefetchScalarGridSpec(
            num_scalar_prefetch=0,
            grid=(n,),                                         # batch only (phases fused)
            in_specs=[
                pl.BlockSpec((1, h, cinw), lambda i: (i, 0, 0)),
                pl.BlockSpec((3, cinw, cout2wo), lambda i: (0, 0, 0)),   # VMEM-resident B
            ],
            out_specs=[
                pl.BlockSpec((1, h, cout2wo), lambda i: (i, 0, 0)),
                pl.BlockSpec((1, 1, cout2wo), lambda i: (i, 0, 0)),
                pl.BlockSpec((1, 1, cout2wo), lambda i: (i, 0, 0)),
            ],
            scratch_shapes=[pltpu.VMEM((h + 2, cinw), jnp.float32)],
        ),
        compiler_params=pltpu.CompilerParams(
            dimension_semantics=("parallel",)),
    )(x_rows, b_mat)

    # --- finish the (tiny) BatchNorm statistics reduction in XLA ---------------
    count = n * ho * wo
    mean = jnp.sum(psum.reshape(n, cout, 2, wo), axis=(0, 2, 3)) / count
    ex2 = jnp.sum(pssq.reshape(n, cout, 2, wo), axis=(0, 2, 3)) / count
    var = jnp.maximum(ex2 - mean * mean, 0.0)                # biased var (train-mode BN)
    scale = gamma / jnp.sqrt(var + eps)
    shift = beta - mean * scale
    scale_row = jnp.repeat(scale, 2 * wo)[None, :].astype(jnp.float32)   # (1, Cout*2*Wo)
    shift_row = jnp.repeat(shift, 2 * wo)[None, :].astype(jnp.float32)

    # --- kernel 2: BN scale/shift + ReLU, writes contiguous NCHW directly ------
    tc = _channel_block(cout, 2 * wo)
    out4 = pl.pallas_call(
        bn_relu_nchw_kernel,
        out_shape=jax.ShapeDtypeStruct((n, cout, h, 2 * wo), jnp.float32),
        grid_spec=pltpu.PrefetchScalarGridSpec(
            num_scalar_prefetch=0,
            grid=(n, cout // tc),                              # batch x channel-block
            in_specs=[
                pl.BlockSpec((1, h, tc * 2 * wo), lambda i, cb: (i, 0, cb)),
                pl.BlockSpec((1, tc * 2 * wo), lambda i, cb: (0, cb)),
                pl.BlockSpec((1, tc * 2 * wo), lambda i, cb: (0, cb)),
            ],
            out_specs=pl.BlockSpec((1, tc, h, 2 * wo), lambda i, cb: (i, cb, 0, 0)),
        ),
        compiler_params=pltpu.CompilerParams(
            dimension_semantics=("parallel", "parallel")),
    )(y, scale_row, shift_row)

    # (N, Cout, H, 2*Wo) and (N, Cout, Ho, Wo) are the same row-major buffer:
    # index (i, a*Wo+q) == output row 2i+a, col q.  Free reshape, no data movement.
    return out4.reshape(n, cout, ho, wo)


# ----------------------------------------------------------------------------
# Pure-JAX reference for verification (includes the bias, to confirm it cancels).
# ----------------------------------------------------------------------------
def up_conv_reference(x_nchw, weight, bias, gamma, beta, eps=1e-5):
    x_up = jnp.repeat(jnp.repeat(x_nchw, 2, axis=2), 2, axis=3)
    y = lax.conv_general_dilated(
        x_up, weight, window_strides=(1, 1), padding="SAME",
        dimension_numbers=("NCHW", "OIHW", "NCHW"),
    ) + bias[None, :, None, None]
    mean = jnp.mean(y, axis=(0, 2, 3))
    var = jnp.var(y, axis=(0, 2, 3))
    y = (y - mean[None, :, None, None]) / jnp.sqrt(var + eps)[None, :, None, None]
    y = y * gamma[None, :, None, None] + beta[None, :, None, None]
    return jnp.maximum(y, 0.0)


if __name__ == "__main__":
    key = jax.random.PRNGKey(0)
    k_x, k_w, k_b, k_g, k_be = jax.random.split(key, 5)

    N, CH_IN, CH_OUT, H, W = 2, 4, 8, 16, 16

    x = jax.random.normal(k_x, (N, CH_IN, H, W), dtype=jnp.float32)
    weight = 0.1 * jax.random.normal(k_w, (CH_OUT, CH_IN, 3, 3), dtype=jnp.float32)
    bias = 0.1 * jax.random.normal(k_b, (CH_OUT,), dtype=jnp.float32)
    gamma = 1.0 + 0.1 * jax.random.normal(k_g, (CH_OUT,), dtype=jnp.float32)
    beta = 0.1 * jax.random.normal(k_be, (CH_OUT,), dtype=jnp.float32)

    fwd = jax.jit(functools.partial(up_conv_forward, eps=1e-5))
    out = fwd(x, weight, bias, gamma, beta)
    out = jax.block_until_ready(out)

    ref = up_conv_reference(x, weight, bias, gamma, beta)
    assert out.shape == (N, CH_OUT, 2 * H, 2 * W), out.shape
    max_err = float(jnp.max(jnp.abs(out - ref)))
    assert jnp.allclose(out, ref, atol=2e-4, rtol=2e-4), max_err

    print("KERNEL_OK")
</pallas_src>

<mosaic_0001>
module attributes {stable_mosaic.version = 11 : i64} {
  func.func @conv_up_kernel(%arg0: i32, %arg1: memref<1x16x64xf32, #tpu.memory_space<vmem>>, %arg2: memref<3x64x512xf32, #tpu.memory_space<vmem>>, %arg3: memref<1x16x512xf32, #tpu.memory_space<vmem>>, %arg4: memref<1x1x512xf32, #tpu.memory_space<vmem>>, %arg5: memref<1x1x512xf32, #tpu.memory_space<vmem>>, %arg6: memref<18x64xf32, #tpu.memory_space<vmem>>) attributes {dimension_semantics = [#tpu.dimension_semantics<parallel>], iteration_bounds = array<i64: 2>, scalar_prefetch = 0 : i64, scratch_operands = 1 : i64, tpu.core_type = #tpu.core_type<tc>, window_params = [{transform_indices = @transform_0, window_bounds = array<i64: 1, 16, 64>}, {pipeline_mode = #tpu.pipeline_mode<synchronous>, transform_indices = @transform_1, window_bounds = array<i64: 3, 64, 512>}, {transform_indices = @transform_2, window_bounds = array<i64: 1, 16, 512>}, {transform_indices = @transform_3, window_bounds = array<i64: 1, 1, 512>}, {transform_indices = @transform_4, window_bounds = array<i64: 1, 1, 512>}]} {
    %cst = arith.constant 0.000000e+00 : f32
    %0 = vector.broadcast %cst : f32 to vector<1x64xf32>
    %c0 = arith.constant 0 : index
    %c0_0 = arith.constant 0 : index
    %1 = vector.load %arg6[%c0, %c0_0] : memref<18x64xf32, #tpu.memory_space<vmem>>, vector<1x64xf32>
    tpu.vector_store %arg6[%c0, %c0_0], %0 {strides = array<i32>} : memref<18x64xf32, #tpu.memory_space<vmem>>, vector<1x64xf32>,
    %c17 = arith.constant 17 : index
    %c0_1 = arith.constant 0 : index
    %2 = vector.load %arg6[%c17, %c0_1] : memref<18x64xf32, #tpu.memory_space<vmem>>, vector<1x64xf32>
    tpu.vector_store %arg6[%c17, %c0_1], %0 {strides = array<i32>} : memref<18x64xf32, #tpu.memory_space<vmem>>, vector<1x64xf32>,
    %c0_2 = arith.constant 0 : index
    %c0_3 = arith.constant 0 : index
    %c0_4 = arith.constant 0 : index
    %3 = vector.load %arg1[%c0_2, %c0_3, %c0_4] : memref<1x16x64xf32, #tpu.memory_space<vmem>>, vector<1x16x64xf32>
    %4 = vector.shape_cast %3 : vector<1x16x64xf32> to vector<16x64xf32>
    %c1 = arith.constant 1 : index
    %c0_5 = arith.constant 0 : index
    %5 = vector.load %arg6[%c1, %c0_5] : memref<18x64xf32, #tpu.memory_space<vmem>>, vector<16x64xf32>
    tpu.vector_store %arg6[%c1, %c0_5], %4 {strides = array<i32>} : memref<18x64xf32, #tpu.memory_space<vmem>>, vector<16x64xf32>,
    %c0_6 = arith.constant 0 : index
    %c0_7 = arith.constant 0 : index
    %6 = vector.load %arg6[%c0_6, %c0_7] : memref<18x64xf32, #tpu.memory_space<vmem>>, vector<16x64xf32>
    %c0_8 = arith.constant 0 : index
    %c0_9 = arith.constant 0 : index
    %c0_10 = arith.constant 0 : index
    %7 = vector.load %arg2[%c0_8, %c0_9, %c0_10] : memref<3x64x512xf32, #tpu.memory_space<vmem>>, vector<1x64x512xf32>
    %8 = vector.shape_cast %7 : vector<1x64x512xf32> to vector<64x512xf32>
    %cst_11 = arith.constant dense<0.000000e+00> : vector<16x512xf32>
    %9 = tpu.matmul %6, %8, %cst_11 {dimension_numbers = #tpu.dot_dimension_numbers<[1], [0], [0], [1], [0, 0, 1, 1], [], []>} : vector<16x64xf32>, vector<64x512xf32>, vector<16x512xf32> -> vector<16x512xf32>
    %c1_12 = arith.constant 1 : index
    %c0_13 = arith.constant 0 : index
    %10 = vector.load %arg6[%c1_12, %c0_13] : memref<18x64xf32, #tpu.memory_space<vmem>>, vector<16x64xf32>
    %c1_14 = arith.constant 1 : index
    %c0_15 = arith.constant 0 : index
    %c0_16 = arith.constant 0 : index
    %11 = vector.load %arg2[%c1_14, %c0_15, %c0_16] : memref<3x64x512xf32, #tpu.memory_space<vmem>>, vector<1x64x512xf32>
    %12 = vector.shape_cast %11 : vector<1x64x512xf32> to vector<64x512xf32>
    %cst_17 = arith.constant dense<0.000000e+00> : vector<16x512xf32>
    %13 = tpu.matmul %10, %12, %cst_17 {dimension_numbers = #tpu.dot_dimension_numbers<[1], [0], [0], [1], [0, 0, 1, 1], [], []>} : vector<16x64xf32>, vector<64x512xf32>, vector<16x512xf32> -> vector<16x512xf32>
    %14 = arith.addf %9, %13 : vector<16x512xf32>
    %c2 = arith.constant 2 : index
    %c0_18 = arith.constant 0 : index
    %15 = vector.load %arg6[%c2, %c0_18] : memref<18x64xf32, #tpu.memory_space<vmem>>, vector<16x64xf32>
    %c2_19 = arith.constant 2 : index
    %c0_20 = arith.constant 0 : index
    %c0_21 = arith.constant 0 : index
    %16 = vector.load %arg2[%c2_19, %c0_20, %c0_21] : memref<3x64x512xf32, #tpu.memory_space<vmem>>, vector<1x64x512xf32>
    %17 = vector.shape_cast %16 : vector<1x64x512xf32> to vector<64x512xf32>
    %cst_22 = arith.constant dense<0.000000e+00> : vector<16x512xf32>
    %18 = tpu.matmul %15, %17, %cst_22 {dimension_numbers = #tpu.dot_dimension_numbers<[1], [0], [0], [1], [0, 0, 1, 1], [], []>} : vector<16x64xf32>, vector<64x512xf32>, vector<16x512xf32> -> vector<16x512xf32>
    %19 = arith.addf %14, %18 : vector<16x512xf32>
    %c0_23 = arith.constant 0 : index
    %c0_24 = arith.constant 0 : index
    %c0_25 = arith.constant 0 : index
    %20 = vector.load %arg3[%c0_23, %c0_24, %c0_25] : memref<1x16x512xf32, #tpu.memory_space<vmem>>, vector<1x16x512xf32>
    %21 = vector.shape_cast %20 : vector<1x16x512xf32> to vector<16x512xf32>
    %22 = vector.shape_cast %19 : vector<16x512xf32> to vector<1x16x512xf32>
    tpu.vector_store %arg3[%c0_23, %c0_24, %c0_25], %22 {strides = array<i32>} : memref<1x16x512xf32, #tpu.memory_space<vmem>>, vector<1x16x512xf32>,
    %cst_26 = arith.constant dense<0.000000e+00> : vector<512xf32>
    %23 = vector.multi_reduction <add>, %19, %cst_26 [0] : vector<16x512xf32> to vector<512xf32>
    %24 = vector.shape_cast %23 : vector<512xf32> to vector<1x512xf32>
    %c0_27 = arith.constant 0 : index
    %c0_28 = arith.constant 0 : index
    %c0_29 = arith.constant 0 : index
    %25 = vector.load %arg4[%c0_27, %c0_28, %c0_29] : memref<1x1x512xf32, #tpu.memory_space<vmem>>, vector<1x1x512xf32>
    %26 = vector.shape_cast %25 : vector<1x1x512xf32> to vector<1x512xf32>
    %27 = vector.shape_cast %24 : vector<1x512xf32> to vector<1x1x512xf32>
    tpu.vector_store %arg4[%c0_27, %c0_28, %c0_29], %27 {strides = array<i32>} : memref<1x1x512xf32, #tpu.memory_space<vmem>>, vector<1x1x512xf32>,
    %28 = arith.mulf %19, %19 : vector<16x512xf32>
    %cst_30 = arith.constant dense<0.000000e+00> : vector<512xf32>
    %29 = vector.multi_reduction <add>, %28, %cst_30 [0] : vector<16x512xf32> to vector<512xf32>
    %30 = vector.shape_cast %29 : vector<512xf32> to vector<1x512xf32>
    %c0_31 = arith.constant 0 : index
    %c0_32 = arith.constant 0 : index
    %c0_33 = arith.constant 0 : index
    %31 = vector.load %arg5[%c0_31, %c0_32, %c0_33] : memref<1x1x512xf32, #tpu.memory_space<vmem>>, vector<1x1x512xf32>
    %32 = vector.shape_cast %31 : vector<1x1x512xf32> to vector<1x512xf32>
    %33 = vector.shape_cast %30 : vector<1x512xf32> to vector<1x1x512xf32>
    tpu.vector_store %arg5[%c0_31, %c0_32, %c0_33], %33 {strides = array<i32>} : memref<1x1x512xf32, #tpu.memory_space<vmem>>, vector<1x1x512xf32>,
    return
  }
  func.func @transform_0(%arg0: i32) -> (i32, i32, i32) {
    %c0_i32 = arith.constant 0 : i32
    %c0_i32_0 = arith.constant 0 : i32
    %c0_i32_1 = arith.constant 0 : i32
    return %arg0, %c0_i32, %c0_i32_0 : i32, i32, i32
  }
  func.func @transform_1(%arg0: i32) -> (i32, i32, i32) {
    %c0_i32 = arith.constant 0 : i32
    %c0_i32_0 = arith.constant 0 : i32
    %c0_i32_1 = arith.constant 0 : i32
    %c0_i32_2 = arith.constant 0 : i32
    return %c0_i32, %c0_i32_0, %c0_i32_1 : i32, i32, i32
  }
  func.func @transform_2(%arg0: i32) -> (i32, i32, i32) {
    %c0_i32 = arith.constant 0 : i32
    %c0_i32_0 = arith.constant 0 : i32
    %c0_i32_1 = arith.constant 0 : i32
    return %arg0, %c0_i32, %c0_i32_0 : i32, i32, i32
  }
  func.func @transform_3(%arg0: i32) -> (i32, i32, i32) {
    %c0_i32 = arith.constant 0 : i32
    %c0_i32_0 = arith.constant 0 : i32
    %c0_i32_1 = arith.constant 0 : i32
    return %arg0, %c0_i32, %c0_i32_0 : i32, i32, i32
  }
  func.func @transform_4(%arg0: i32) -> (i32, i32, i32) {
    %c0_i32 = arith.constant 0 : i32
    %c0_i32_0 = arith.constant 0 : i32
    %c0_i32_1 = arith.constant 0 : i32
    return %arg0, %c0_i32, %c0_i32_0 : i32, i32, i32
  }
}

module attributes {stable_mosaic.version = 11 : i64} {
  func.func @bn_relu_nchw_kernel(%arg0: i32, %arg1: i32, %arg2: memref<1x16x512xf32, #tpu.memory_space<vmem>>, %arg3: memref<1x512xf32, #tpu.memory_space<vmem>>, %arg4: memref<1x512xf32, #tpu.memory_space<vmem>>, %arg5: memref<1x8x16x64xf32, #tpu.memory_space<vmem>>) attributes {dimension_semantics = [#tpu.dimension_semantics<parallel>, #tpu.dimension_semantics<parallel>], iteration_bounds = array<i64: 2, 1>, scalar_prefetch = 0 : i64, scratch_operands = 0 : i64, tpu.core_type = #tpu.core_type<tc>, window_params = [{transform_indices = @transform_0, window_bounds = array<i64: 1, 16, 512>}, {transform_indices = @transform_1, window_bounds = array<i64: 1, 512>}, {transform_indices = @transform_2, window_bounds = array<i64: 1, 512>}, {transform_indices = @transform_3, window_bounds = array<i64: 1, 8, 16, 64>}]} {
    %c0 = arith.constant 0 : index
    %c0_0 = arith.constant 0 : index
    %c0_1 = arith.constant 0 : index
    %0 = vector.load %arg2[%c0, %c0_0, %c0_1] : memref<1x16x512xf32, #tpu.memory_space<vmem>>, vector<1x16x512xf32>
    %1 = vector.shape_cast %0 : vector<1x16x512xf32> to vector<16x512xf32>
    %c0_2 = arith.constant 0 : index
    %c0_3 = arith.constant 0 : index
    %2 = vector.load %arg3[%c0_2, %c0_3] : memref<1x512xf32, #tpu.memory_space<vmem>>, vector<1x512xf32>
    %3 = vector.broadcast %2 : vector<1x512xf32> to vector<16x512xf32>
    %4 = arith.mulf %1, %3 : vector<16x512xf32>
    %c0_4 = arith.constant 0 : index
    %c0_5 = arith.constant 0 : index
    %5 = vector.load %arg4[%c0_4, %c0_5] : memref<1x512xf32, #tpu.memory_space<vmem>>, vector<1x512xf32>
    %6 = vector.broadcast %5 : vector<1x512xf32> to vector<16x512xf32>
    %7 = arith.addf %4, %6 : vector<16x512xf32>
    %cst = arith.constant 0.000000e+00 : f32
    %8 = vector.broadcast %cst : f32 to vector<16x512xf32>
    %9 = arith.maximumf %7, %8 : vector<16x512xf32>
    %10 = vector.extract_strided_slice %9 {offsets = [0, 0], sizes = [16, 64], strides = [1, 1]} : vector<16x512xf32> to vector<16x64xf32>
    %c0_6 = arith.constant 0 : index
    %c0_7 = arith.constant 0 : index
    %c0_8 = arith.constant 0 : index
    %c0_9 = arith.constant 0 : index
    %11 = vector.load %arg5[%c0_6, %c0_7, %c0_8, %c0_9] : memref<1x8x16x64xf32, #tpu.memory_space<vmem>>, vector<1x1x16x64xf32>
    %12 = vector.shape_cast %11 : vector<1x1x16x64xf32> to vector<16x64xf32>
    %13 = vector.shape_cast %10 : vector<16x64xf32> to vector<1x1x16x64xf32>
    tpu.vector_store %arg5[%c0_6, %c0_7, %c0_8, %c0_9], %13 {strides = array<i32>} : memref<1x8x16x64xf32, #tpu.memory_space<vmem>>, vector<1x1x16x64xf32>,
    %14 = vector.extract_strided_slice %9 {offsets = [0, 64], sizes = [16, 64], strides = [1, 1]} : vector<16x512xf32> to vector<16x64xf32>
    %c0_10 = arith.constant 0 : index
    %c1 = arith.constant 1 : index
    %c0_11 = arith.constant 0 : index
    %c0_12 = arith.constant 0 : index
    %15 = vector.load %arg5[%c0_10, %c1, %c0_11, %c0_12] : memref<1x8x16x64xf32, #tpu.memory_space<vmem>>, vector<1x1x16x64xf32>
    %16 = vector.shape_cast %15 : vector<1x1x16x64xf32> to vector<16x64xf32>
    %17 = vector.shape_cast %14 : vector<16x64xf32> to vector<1x1x16x64xf32>
    tpu.vector_store %arg5[%c0_10, %c1, %c0_11, %c0_12], %17 {strides = array<i32>} : memref<1x8x16x64xf32, #tpu.memory_space<vmem>>, vector<1x1x16x64xf32>,
    %18 = vector.extract_strided_slice %9 {offsets = [0, 128], sizes = [16, 64], strides = [1, 1]} : vector<16x512xf32> to vector<16x64xf32>
    %c0_13 = arith.constant 0 : index
    %c2 = arith.constant 2 : index
    %c0_14 = arith.constant 0 : index
    %c0_15 = arith.constant 0 : index
    %19 = vector.load %arg5[%c0_13, %c2, %c0_14, %c0_15] : memref<1x8x16x64xf32, #tpu.memory_space<vmem>>, vector<1x1x16x64xf32>
    %20 = vector.shape_cast %19 : vector<1x1x16x64xf32> to vector<16x64xf32>
    %21 = vector.shape_cast %18 : vector<16x64xf32> to vector<1x1x16x64xf32>
    tpu.vector_store %arg5[%c0_13, %c2, %c0_14, %c0_15], %21 {strides = array<i32>} : memref<1x8x16x64xf32, #tpu.memory_space<vmem>>, vector<1x1x16x64xf32>,
    %22 = vector.extract_strided_slice %9 {offsets = [0, 192], sizes = [16, 64], strides = [1, 1]} : vector<16x512xf32> to vector<16x64xf32>
    %c0_16 = arith.constant 0 : index
    %c3 = arith.constant 3 : index
    %c0_17 = arith.constant 0 : index
    %c0_18 = arith.constant 0 : index
    %23 = vector.load %arg5[%c0_16, %c3, %c0_17, %c0_18] : memref<1x8x16x64xf32, #tpu.memory_space<vmem>>, vector<1x1x16x64xf32>
    %24 = vector.shape_cast %23 : vector<1x1x16x64xf32> to vector<16x64xf32>
    %25 = vector.shape_cast %22 : vector<16x64xf32> to vector<1x1x16x64xf32>
    tpu.vector_store %arg5[%c0_16, %c3, %c0_17, %c0_18], %25 {strides = array<i32>} : memref<1x8x16x64xf32, #tpu.memory_space<vmem>>, vector<1x1x16x64xf32>,
    %26 = vector.extract_strided_slice %9 {offsets = [0, 256], sizes = [16, 64], strides = [1, 1]} : vector<16x512xf32> to vector<16x64xf32>
    %c0_19 = arith.constant 0 : index
    %c4 = arith.constant 4 : index
    %c0_20 = arith.constant 0 : index
    %c0_21 = arith.constant 0 : index
    %27 = vector.load %arg5[%c0_19, %c4, %c0_20, %c0_21] : memref<1x8x16x64xf32, #tpu.memory_space<vmem>>, vector<1x1x16x64xf32>
    %28 = vector.shape_cast %27 : vector<1x1x16x64xf32> to vector<16x64xf32>
    %29 = vector.shape_cast %26 : vector<16x64xf32> to vector<1x1x16x64xf32>
    tpu.vector_store %arg5[%c0_19, %c4, %c0_20, %c0_21], %29 {strides = array<i32>} : memref<1x8x16x64xf32, #tpu.memory_space<vmem>>, vector<1x1x16x64xf32>,
    %30 = vector.extract_strided_slice %9 {offsets = [0, 320], sizes = [16, 64], strides = [1, 1]} : vector<16x512xf32> to vector<16x64xf32>
    %c0_22 = arith.constant 0 : index
    %c5 = arith.constant 5 : index
    %c0_23 = arith.constant 0 : index
    %c0_24 = arith.constant 0 : index
    %31 = vector.load %arg5[%c0_22, %c5, %c0_23, %c0_24] : memref<1x8x16x64xf32, #tpu.memory_space<vmem>>, vector<1x1x16x64xf32>
    %32 = vector.shape_cast %31 : vector<1x1x16x64xf32> to vector<16x64xf32>
    %33 = vector.shape_cast %30 : vector<16x64xf32> to vector<1x1x16x64xf32>
    tpu.vector_store %arg5[%c0_22, %c5, %c0_23, %c0_24], %33 {strides = array<i32>} : memref<1x8x16x64xf32, #tpu.memory_space<vmem>>, vector<1x1x16x64xf32>,
    %34 = vector.extract_strided_slice %9 {offsets = [0, 384], sizes = [16, 64], strides = [1, 1]} : vector<16x512xf32> to vector<16x64xf32>
    %c0_25 = arith.constant 0 : index
    %c6 = arith.constant 6 : index
    %c0_26 = arith.constant 0 : index
    %c0_27 = arith.constant 0 : index
    %35 = vector.load %arg5[%c0_25, %c6, %c0_26, %c0_27] : memref<1x8x16x64xf32, #tpu.memory_space<vmem>>, vector<1x1x16x64xf32>
    %36 = vector.shape_cast %35 : vector<1x1x16x64xf32> to vector<16x64xf32>
    %37 = vector.shape_cast %34 : vector<16x64xf32> to vector<1x1x16x64xf32>
    tpu.vector_store %arg5[%c0_25, %c6, %c0_26, %c0_27], %37 {strides = array<i32>} : memref<1x8x16x64xf32, #tpu.memory_space<vmem>>, vector<1x1x16x64xf32>,
    %38 = vector.extract_strided_slice %9 {offsets = [0, 448], sizes = [16, 64], strides = [1, 1]} : vector<16x512xf32> to vector<16x64xf32>
    %c0_28 = arith.constant 0 : index
    %c7 = arith.constant 7 : index
    %c0_29 = arith.constant 0 : index
    %c0_30 = arith.constant 0 : index
    %39 = vector.load %arg5[%c0_28, %c7, %c0_29, %c0_30] : memref<1x8x16x64xf32, #tpu.memory_space<vmem>>, vector<1x1x16x64xf32>
    %40 = vector.shape_cast %39 : vector<1x1x16x64xf32> to vector<16x64xf32>
    %41 = vector.shape_cast %38 : vector<16x64xf32> to vector<1x1x16x64xf32>
    tpu.vector_store %arg5[%c0_28, %c7, %c0_29, %c0_30], %41 {strides = array<i32>} : memref<1x8x16x64xf32, #tpu.memory_space<vmem>>, vector<1x1x16x64xf32>,
    return
  }
  func.func @transform_0(%arg0: i32, %arg1: i32) -> (i32, i32, i32) {
    %c0_i32 = arith.constant 0 : i32
    %c0_i32_0 = arith.constant 0 : i32
    return %arg0, %c0_i32, %arg1 : i32, i32, i32
  }
  func.func @transform_1(%arg0: i32, %arg1: i32) -> (i32, i32) {
    %c0_i32 = arith.constant 0 : i32
    %c0_i32_0 = arith.constant 0 : i32
    return %c0_i32, %arg1 : i32, i32
  }
  func.func @transform_2(%arg0: i32, %arg1: i32) -> (i32, i32) {
    %c0_i32 = arith.constant 0 : i32
    %c0_i32_0 = arith.constant 0 : i32
    return %c0_i32, %arg1 : i32, i32
  }
  func.func @transform_3(%arg0: i32, %arg1: i32) -> (i32, i32, i32, i32) {
    %c0_i32 = arith.constant 0 : i32
    %c0_i32_0 = arith.constant 0 : i32
    %c0_i32_1 = arith.constant 0 : i32
    return %arg0, %arg1, %c0_i32, %c0_i32_0 : i32, i32, i32, i32
  }
}

</mosaic_0001>

<bundles_post_ra>
// kernel: up_conv_forward.2
= control target key start
LH: loop header
LB: loop body
LE: loop exit
PB: predicated region body
PF: predicated region fallthrough
CT: control target
= control target key end

     0   :  { %s1208_s15 = smov 0   ;;  %s1576_s0 = inlined_call_operand.vmem [shape: f32[2,16,64], index: 0, kind: input, shape index: {}]   ;;  %s1577_s1 = inlined_call_operand.vmem [shape: f32[3,64,512], index: 1, kind: input, shape index: {}]   ;;  %s1578_s2 = inlined_call_operand.vmem [shape: f32[2,16,512], index: 2, kind: output, shape index: {0}]   ;;  %s1579_s3 = inlined_call_operand.vmem [shape: f32[2,1,512], index: 3, kind: output, shape index: {1}]   ;;  %s1580_s4 = inlined_call_operand.vmem [shape: f32[2,1,512], index: 4, kind: output, shape index: {2}]  }
   0x1 LB: > { %s1072_s16 = sadd.s32 4294967295, %s1179_s15   ;;  %p1076_p0 = scmp.ge.s32.totalorder %s1179_s15, 1  ;;  %s1179_s15 = sphi %s1208_s15, %s15_s15  }
   0x2   : > { %p167_p1 = scmp.lt.s32.totalorder %s1179_s15, 3 }
   0x4   : > { %p168_p2 = pnand %p1076_p0, %p167_p1 }
   0x5   : > { %p201_p3 = scmp.lt.s32.totalorder (!%p168_p2), %s1072_s16, 1 }
   0x6   : > { %171 = sbr.rel (%p168_p2) target bundleno = 297 (0x129), region = 28 }
   0xb   : > { %v1112_v0 = vld [vmem:[%s1577_s1 + $0x1e8] sm:$0xff]  ;;  %v1114_v1 = vld [vmem:[%s1577_s1 + $0x1f8] sm:$0xff]  ;;  %v1111_v2 = vld [vmem:[%s1577_s1 + $0x1e0] sm:$0xff]  ;;  %vm219_vm0 = vcmask 516096   ;;  %s1582_s16 = smov (!%p201_p3, %s1072_s16), 1  ;;  %v1181_v9 = vmov 0.0  }
   0xc   : > { %318 = vmatprep.subr.mxu0 %v1112_v0  ;;  %395 = vmatprep.subr.mxu1 %v1114_v1  ;;  %v1113_v3 = vld [vmem:[%s1577_s1 + $0x1f0] sm:$0xff]  ;;  %v1108_v4 = vld [vmem:[%s1577_s1 + $0x1c8] sm:$0xff]  ;;  %v1110_v5 = vld [vmem:[%s1577_s1 + $0x1d8] sm:$0xff]  ;;  %220 = vst.msk [vmem:[#allocation2] sm:$0x1] %vm219_vm0, %v1181_v9  ;;  %s1161_s21 = sshll.u32 %s1582_s16, 4 }
   0xd   : > { %319 = vmatpush1.msra.mxu0 %v1111_v2  ;;  %396 = vmatpush1.msra.mxu1 %v1113_v3  ;;  %v1107_v6 = vld [vmem:[%s1577_s1 + $0x1c0] sm:$0xff]  ;;  %v1109_v7 = vld [vmem:[%s1577_s1 + $0x1d0] sm:$0xff]  ;;  %v1104_v8 = vld [vmem:[%s1577_s1 + $0x1a8] sm:$0xff]  ;;  %221 = vst.msk [vmem:[#allocation2 + $0x11] sm:$0x1] %vm219_vm0, %v1181_v9  ;;  %s1284_s10 = scalar_lea.vmem %s1576_s0, %s1161_s21  ;;  %vm224_vm1 = vcmask 523264  }
   0xe   : > { %320 = vmatprep.subr.mxu0 %v1108_v4  ;;  %397 = vmatprep.subr.mxu1 %v1110_v5  ;;  %v1106_v10 = vld [vmem:[%s1577_s1 + $0x1b8] sm:$0xff]  ;;  %v1103_v11 = vld [vmem:[%s1577_s1 + $0x1a0] sm:$0xff]  ;;  %v1105_v12 = vld [vmem:[%s1577_s1 + $0x1b0] sm:$0xff]  ;;  %s1162_s22 = sshll.u32 %s1582_s16, 6  ;;  %s1081_s26 = sshll.u32 %s1582_s16, 2 }
   0xf   : > { %321 = vmatpush1.msra.mxu0 %v1107_v6  ;;  %398 = vmatpush1.msra.mxu1 %v1109_v7  ;;  %v1100_v13 = vld [vmem:[%s1577_s1 + $0x188] sm:$0xff]  ;;  %v1102_v14 = vld [vmem:[%s1577_s1 + $0x198] sm:$0xff]  ;;  %v1099_v15 = vld [vmem:[%s1577_s1 + $0x180] sm:$0xff]  ;;  %s1546_s25 = scalar_lea.vmem %s1578_s2, %s1162_s22  ;;  %s214_s29 = scalar_lea.vmem %s1579_s3, %s1081_s26 }
  0x10   : > { %322 = vmatprep.subr.mxu0 %v1104_v8  ;;  %399 = vmatprep.subr.mxu1 %v1106_v10  ;;  %v1101_v16 = vld [vmem:[%s1577_s1 + $0x190] sm:$0xff]  ;;  %v1096_v17 = vld [vmem:[%s1577_s1 + $0x168] sm:$0xff]  ;;  %v1098_v18 = vld [vmem:[%s1577_s1 + $0x178] sm:$0xff] }
  0x11   : > { %323 = vmatpush1.msra.mxu0 %v1103_v11  ;;  %400 = vmatpush1.msra.mxu1 %v1105_v12  ;;  %v1095_v19 = vld [vmem:[%s1577_s1 + $0x160] sm:$0xff]  ;;  %v1097_v20 = vld [vmem:[%s1577_s1 + $0x170] sm:$0xff]  ;;  %v1092_v21 = vld [vmem:[%s1577_s1 + $0x148] sm:$0xff] }
  0x12   : > { %324 = vmatprep.subr.mxu0 %v1100_v13  ;;  %401 = vmatprep.subr.mxu1 %v1102_v14  ;;  %v1094_v22 = vld [vmem:[%s1577_s1 + $0x158] sm:$0xff]  ;;  %v1091_v23 = vld [vmem:[%s1577_s1 + $0x140] sm:$0xff]  ;;  %v1093_v24 = vld [vmem:[%s1577_s1 + $0x150] sm:$0xff] }
  0x13   : > { %325 = vmatpush1.msra.mxu0 %v1099_v15  ;;  %402 = vmatpush1.msra.mxu1 %v1101_v16  ;;  %v1088_v25 = vld [vmem:[%s1577_s1 + $0x128] sm:$0xff]  ;;  %v1090_v26 = vld [vmem:[%s1577_s1 + $0x138] sm:$0xff]  ;;  %v222_v27 = vld [vmem:[%s1284_s10] sm:$0xff] }
  0x14   : > { %326 = vmatprep.subr.mxu0 %v1096_v17  ;;  %403 = vmatprep.subr.mxu1 %v1098_v18  ;;  %v1087_v28 = vld [vmem:[%s1577_s1 + $0x120] sm:$0xff]  ;;  %v1089_v29 = vld [vmem:[%s1577_s1 + $0x130] sm:$0xff]  ;;  %225 = vst.msk [vmem:[#allocation2 + $0x1] sm:$0xff] %vm224_vm1, %v222_v27  ;;  %v1084_v30 = vld [vmem:[%s1577_s1 + $0x108] sm:$0xff] }
  0x15   : > { %327 = vmatpush1.msra.mxu0 %v1095_v19  ;;  %404 = vmatpush1.msra.mxu1 %v1097_v20  ;;  %v1086_v31 = vld [vmem:[%s1577_s1 + $0x118] sm:$0xff]  ;;  %v1083_v32 = vld [vmem:[%s1577_s1 + $0x100] sm:$0xff]  ;;  %v1085_v33 = vld [vmem:[%s1577_s1 + $0x110] sm:$0xff] }
  0x16   : > { %328 = vmatprep.subr.mxu0 %v1092_v21  ;;  %405 = vmatprep.subr.mxu1 %v1094_v22  ;;  %v258_v34 = vld [vmem:[%s1577_s1 + $0xe8] sm:$0xff]  ;;  %v260_v35 = vld [vmem:[%s1577_s1 + $0xf8] sm:$0xff]  ;;  %v257_v36 = vld [vmem:[%s1577_s1 + $0xe0] sm:$0xff] }
  0x17   : > { %329 = vmatpush1.msra.mxu0 %v1091_v23  ;;  %406 = vmatpush1.msra.mxu1 %v1093_v24  ;;  %v259_v37 = vld [vmem:[%s1577_s1 + $0xf0] sm:$0xff]  ;;  %v254_v38 = vld [vmem:[%s1577_s1 + $0xc8] sm:$0xff]  ;;  %v256_v40 = vld [vmem:[%s1577_s1 + $0xd8] sm:$0xff] }
  0x18   : > { %330 = vmatprep.subr.mxu0 %v1088_v25  ;;  %407 = vmatprep.subr.mxu1 %v1090_v26  ;;  %v223_v41 = vld [vmem:[%s1284_s10 + $0x8] sm:$0xff]  ;;  %v253_v42 = vld [vmem:[%s1577_s1 + $0xc0] sm:$0xff]  ;;  %v255_v43 = vld [vmem:[%s1577_s1 + $0xd0] sm:$0xff]  ;;  %s218_s10 = scalar_lea.vmem %s1580_s4, %s1081_s26 }
  0x19   : > { %331 = vmatpush1.msra.mxu0 %v1087_v28  ;;  %408 = vmatpush1.msra.mxu1 %v1089_v29  ;;  %226 = vst.msk [vmem:[#allocation2 + $0x9] sm:$0xff] %vm224_vm1, %v223_v41  ;;  %v250_v44 = vld [vmem:[%s1577_s1 + $0xa8] sm:$0xff]  ;;  %v252_v45 = vld [vmem:[%s1577_s1 + $0xb8] sm:$0xff]  ;;  %v249_v46 = vld [vmem:[%s1577_s1 + $0xa0] sm:$0xff] }
  0x1a   : > { %332 = vmatprep.subr.mxu0 %v1084_v30  ;;  %409 = vmatprep.subr.mxu1 %v1086_v31  ;;  %v251_v47 = vld [vmem:[%s1577_s1 + $0xb0] sm:$0xff]  ;;  %v246_v48 = vld [vmem:[%s1577_s1 + $0x88] sm:$0xff]  ;;  %v248_v49 = vld [vmem:[%s1577_s1 + $0x98] sm:$0xff] }
  0x1b   : > { %333 = vmatpush1.msra.mxu0 %v1083_v32  ;;  %366 = vmatprep.mubr.f32.mxu0 %v1181_v9  ;;  %v261_v39 = vld [vmem:[#allocation2 + $0x1] sm:$0xff]  ;;  %v247_v51 = vld [vmem:[%s1577_s1 + $0x90] sm:$0xff]  ;;  %v244_v53 = vld [vmem:[%s1577_s1 + $0x78] sm:$0xff] }
  0x1c   : > { %410 = vmatpush1.msra.mxu1 %v1085_v33  ;;  %443 = vmatprep.mubr.f32.mxu1 %v1181_v9  ;;  %v245_v50 = vld [vmem:[%s1577_s1 + $0x80] sm:$0xff]  ;;  %v242_v52 = vld [vmem:[%s1577_s1 + $0x68] sm:$0xff]  ;;  %v243_v55 = vld [vmem:[%s1577_s1 + $0x70] sm:$0xff] }
  0x1d   : > { %478 = vmatprep.subr.mxu0 %v258_v34  ;;  %555 = vmatprep.subr.mxu1 %v260_v35  ;;  %v241_v54 = vld [vmem:[%s1577_s1 + $0x60] sm:$0xff]  ;;  %v238_v56 = vld [vmem:[%s1577_s1 + $0x48] sm:$0xff]  ;;  %v240_v57 = vld [vmem:[%s1577_s1 + $0x58] sm:$0xff] }
  0x1e   : > { %1115 = vmatmul.mubr.msk.f32.vlgmr.msra.gmra.mxu0 %vm224_vm1, %v261_v39  ;;  %1117 = vmatmul.mubr.msk.f32.vlgmr.msra.gmra.mxu1 %vm224_vm1, %v261_v39  ;;  %v237_v59 = vld [vmem:[%s1577_s1 + $0x40] sm:$0xff]  ;;  %v239_v60 = vld [vmem:[%s1577_s1 + $0x50] sm:$0xff]  ;;  %v234_v61 = vld [vmem:[%s1577_s1 + $0x28] sm:$0xff] }
  0x1f   : > { %479 = vmatpush1.msra.mxu0 %v257_v36  ;;  %556 = vmatpush1.msra.mxu1 %v259_v37  ;;  %v236_v62 = vld [vmem:[%s1577_s1 + $0x38] sm:$0xff]  ;;  %v233_v63 = vld [vmem:[%s1577_s1 + $0x20] sm:$0xff]  ;;  %v235_v0 = vld [vmem:[%s1577_s1 + $0x30] sm:$0xff] }
  0x20   : > { %480 = vmatprep.subr.mxu0 %v254_v38  ;;  %557 = vmatprep.subr.mxu1 %v256_v40  ;;  %v262_v58 = vld [vmem:[#allocation2 + $0x9] sm:$0xff]  ;;  %v232_v2 = vld [vmem:[%s1577_s1 + $0x18] sm:$0xff]  ;;  %v229_v3 = vld [vmem:[%s1577_s1] sm:$0xff] }
  0x21   : > { %481 = vmatpush1.msra.mxu0 %v253_v42  ;;  %558 = vmatpush1.msra.mxu1 %v255_v43  ;;  %v230_v1 = vld [vmem:[%s1577_s1 + $0x8] sm:$0xff]  ;;  %v231_v4 = vld [vmem:[%s1577_s1 + $0x10] sm:$0xff]  ;;  %v227_v5 = vld [vmem:[#allocation2] sm:$0xff] }
  0x22   : > { %482 = vmatprep.subr.mxu0 %v250_v44  ;;  %559 = vmatprep.subr.mxu1 %v252_v45  ;;  %v1152_v6 = vld [vmem:[%s1577_s1 + $0x2e8] sm:$0xff]  ;;  %v1154_v7 = vld [vmem:[%s1577_s1 + $0x2f8] sm:$0xff]  ;;  %v1151_v8 = vld [vmem:[%s1577_s1 + $0x2e0] sm:$0xff] }
  0x23   : > { %483 = vmatpush1.msra.mxu0 %v249_v46  ;;  %560 = vmatpush1.msra.mxu1 %v251_v47  ;;  %v1153_v10 = vld [vmem:[%s1577_s1 + $0x2f0] sm:$0xff]  ;;  %v1148_v11 = vld [vmem:[%s1577_s1 + $0x2c8] sm:$0xff]  ;;  %v1150_v12 = vld [vmem:[%s1577_s1 + $0x2d8] sm:$0xff] }
  0x24   : > { %484 = vmatprep.subr.mxu0 %v246_v48  ;;  %561 = vmatprep.subr.mxu1 %v248_v49  ;;  %v1147_v13 = vld [vmem:[%s1577_s1 + $0x2c0] sm:$0xff]  ;;  %v1149_v14 = vld [vmem:[%s1577_s1 + $0x2d0] sm:$0xff]  ;;  %v228_v15 = vld [vmem:[#allocation2 + $0x8] sm:$0xff] }
  0x25   : > { %485 = vmatpush1.msra.mxu0 %v245_v50  ;;  %562 = vmatpush1.msra.mxu1 %v247_v51  ;;  %v1144_v16 = vld [vmem:[%s1577_s1 + $0x2a8] sm:$0xff]  ;;  %v1146_v17 = vld [vmem:[%s1577_s1 + $0x2b8] sm:$0xff]  ;;  %v1143_v18 = vld [vmem:[%s1577_s1 + $0x2a0] sm:$0xff] }
  0x26   : > { %486 = vmatprep.subr.mxu0 %v242_v52  ;;  %563 = vmatprep.subr.mxu1 %v244_v53  ;;  %v1145_v19 = vld [vmem:[%s1577_s1 + $0x2b0] sm:$0xff]  ;;  %v1140_v20 = vld [vmem:[%s1577_s1 + $0x288] sm:$0xff]  ;;  %v1142_v21 = vld [vmem:[%s1577_s1 + $0x298] sm:$0xff] }
  0x27   : > { %487 = vmatpush1.msra.mxu0 %v241_v54  ;;  %564 = vmatpush1.msra.mxu1 %v243_v55  ;;  %v1139_v22 = vld [vmem:[%s1577_s1 + $0x280] sm:$0xff]  ;;  %v1141_v23 = vld [vmem:[%s1577_s1 + $0x290] sm:$0xff]  ;;  %v1136_v24 = vld [vmem:[%s1577_s1 + $0x268] sm:$0xff] }
  0x28   : > { %372 = vmatprep.mubr.f32.mxu0 %v1181_v9  ;;  %449 = vmatprep.mubr.f32.mxu1 %v1181_v9  ;;  %v1138_v25 = vld [vmem:[%s1577_s1 + $0x278] sm:$0xff]  ;;  %v1135_v26 = vld [vmem:[%s1577_s1 + $0x260] sm:$0xff]  ;;  %v1137_v27 = vld [vmem:[%s1577_s1 + $0x270] sm:$0xff] }
  0x29   : > { %488 = vmatprep.subr.mxu0 %v238_v56  ;;  %565 = vmatprep.subr.mxu1 %v240_v57  ;;  %v1132_v28 = vld [vmem:[%s1577_s1 + $0x248] sm:$0xff]  ;;  %v1134_v29 = vld [vmem:[%s1577_s1 + $0x258] sm:$0xff]  ;;  %v1131_v30 = vld [vmem:[%s1577_s1 + $0x240] sm:$0xff] }
  0x2a   : > { %1116 = vmatmul.mubr.msk.f32.gmra.mxu0 %vm224_vm1, %v262_v58  ;;  %1118 = vmatmul.mubr.msk.f32.gmra.mxu1 %vm224_vm1, %v262_v58  ;;  %v1133_v31 = vld [vmem:[%s1577_s1 + $0x250] sm:$0xff]  ;;  %v1128_v32 = vld [vmem:[%s1577_s1 + $0x228] sm:$0xff]  ;;  %v1130_v33 = vld [vmem:[%s1577_s1 + $0x238] sm:$0xff] }
  0x2b   : > { %489 = vmatpush1.msra.mxu0 %v237_v59  ;;  %566 = vmatpush1.msra.mxu1 %v239_v60  ;;  %v1127_v34 = vld [vmem:[%s1577_s1 + $0x220] sm:$0xff]  ;;  %v1129_v35 = vld [vmem:[%s1577_s1 + $0x230] sm:$0xff]  ;;  %v1124_v36 = vld [vmem:[%s1577_s1 + $0x208] sm:$0xff] }
  0x2c   : > { %490 = vmatprep.subr.mxu0 %v234_v61  ;;  %567 = vmatprep.subr.mxu1 %v236_v62  ;;  %v1126_v37 = vld [vmem:[%s1577_s1 + $0x218] sm:$0xff]  ;;  %v1123_v38 = vld [vmem:[%s1577_s1 + $0x200] sm:$0xff]  ;;  %v1125_v39 = vld [vmem:[%s1577_s1 + $0x210] sm:$0xff]  ;;  %v1182_v61 = vmov 1966171168  }
  0x2d   : > { %491 = vmatpush1.msra.mxu0 %v233_v63  ;;  %568 = vmatpush1.msra.mxu1 %v235_v0  ;;  %v616_v40 = vld [vmem:[#allocation2 + $0x2] sm:$0xff]  ;;  %v617_v41 = vld [vmem:[#allocation2 + $0xa] sm:$0xff]  ;;  %v1548_v62 = vunpack.c.l.s4 %v1182_v61  ;;  %v864_v63 = vlaneseq }
  0x2e   : > { %492 = vmatprep.subr.mxu0 %v230_v1  ;;  %569 = vmatprep.subr.mxu1 %v232_v2 }
  0x2f   : > { %493 = vmatpush1.msra.mxu0 %v229_v3  ;;  %526 = vmatprep.mubr.f32.mxu0 %v1181_v9  ;;  %vm886_vm2 = vcmp.lt.s32.totalorder %v864_v63, 512 }
  0x30   : > { %570 = vmatpush1.msra.mxu1 %v231_v4  ;;  %603 = vmatprep.mubr.f32.mxu1 %v1181_v9 }
  0x31   : > { %1119 = vmatmul.mubr.msk.f32.vlgmr.msra.gmra.mxu0 %vm224_vm1, %v227_v5  ;;  %1121 = vmatmul.mubr.msk.f32.vlgmr.msra.gmra.mxu1 %vm224_vm1, %v227_v5 }
  0x32   : > { %673 = vmatprep.subr.mxu0 %v1152_v6  ;;  %750 = vmatprep.subr.mxu1 %v1154_v7 }
  0x33   : > { %674 = vmatpush1.msra.mxu0 %v1151_v8  ;;  %751 = vmatpush1.msra.mxu1 %v1153_v10 }
  0x34   : > { %675 = vmatprep.subr.mxu0 %v1148_v11  ;;  %752 = vmatprep.subr.mxu1 %v1150_v12 }
  0x35   : > { %532 = vmatprep.mubr.f32.mxu0 %v1181_v9  ;;  %609 = vmatprep.mubr.f32.mxu1 %v1181_v9 }
  0x36   : > { %676 = vmatpush1.msra.mxu0 %v1147_v13  ;;  %753 = vmatpush1.msra.mxu1 %v1149_v14 }
  0x37   : > { %1120 = vmatmul.mubr.msk.f32.gmra.mxu0 %vm224_vm1, %v228_v15  ;;  %1122 = vmatmul.mubr.msk.f32.gmra.mxu1 %vm224_vm1, %v228_v15  ;;  %v863_v15 = vunpack.c.0.s8 %v1548_v62 }
  0x38   : > { %677 = vmatprep.subr.mxu0 %v1144_v16  ;;  %754 = vmatprep.subr.mxu1 %v1146_v17  ;;  %v1556_v16 = vshrl.u32 %v864_v63, 7 }
  0x39   : > { %678 = vmatpush1.msra.mxu0 %v1143_v18  ;;  %755 = vmatpush1.msra.mxu1 %v1145_v19 }
  0x3a   : > { %679 = vmatprep.subr.mxu0 %v1140_v20  ;;  %756 = vmatprep.subr.mxu1 %v1142_v21 }
  0x3b   : > { %680 = vmatpush1.msra.mxu0 %v1139_v22  ;;  %757 = vmatpush1.msra.mxu1 %v1141_v23 }
  0x3c   : > { %681 = vmatprep.subr.mxu0 %v1136_v24  ;;  %758 = vmatprep.subr.mxu1 %v1138_v25 }
  0x3d   : > { %682 = vmatpush1.msra.mxu0 %v1135_v26  ;;  %759 = vmatpush1.msra.mxu1 %v1137_v27 }
  0x3e   : > { %683 = vmatprep.subr.mxu0 %v1132_v28  ;;  %760 = vmatprep.subr.mxu1 %v1134_v29 }
  0x3f   : > { %684 = vmatpush1.msra.mxu0 %v1131_v30  ;;  %761 = vmatpush1.msra.mxu1 %v1133_v31 }
  0x40   : > { %685 = vmatprep.subr.mxu0 %v1128_v32  ;;  %762 = vmatprep.subr.mxu1 %v1130_v33 }
  0x41   : > { %686 = vmatpush1.msra.mxu0 %v1127_v34  ;;  %763 = vmatpush1.msra.mxu1 %v1129_v35 }
  0x42   : > { %687 = vmatprep.subr.mxu0 %v1124_v36  ;;  %764 = vmatprep.subr.mxu1 %v1126_v37 }
  0x43   : > { %688 = vmatpush1.msra.mxu0 %v1123_v38  ;;  %721 = vmatprep.mubr.f32.mxu0 %v1181_v9 }
  0x44   : > { %765 = vmatpush1.msra.mxu1 %v1125_v39  ;;  %798 = vmatprep.mubr.f32.mxu1 %v1181_v9 }
  0x45   : > { %1155 = vmatmul.mubr.msk.f32.vlgmr.msra.gmra.mxu0 %vm224_vm1, %v616_v40  ;;  %1157 = vmatmul.mubr.msk.f32.vlgmr.msra.gmra.mxu1 %vm224_vm1, %v616_v40 }
  0x46   : > { %727 = vmatprep.mubr.f32.mxu0 %v1181_v9  ;;  %804 = vmatprep.mubr.f32.mxu1 %v1181_v9 }
  0x49   : > { %1156 = vmatmul.mubr.msk.f32.gmra.mxu0 %vm224_vm1, %v617_v41  ;;  %1158 = vmatmul.mubr.msk.f32.gmra.mxu1 %vm224_vm1, %v617_v41 }
  0xde   : > { %v368_v42 = vpop.f32.mrf.mxu0  ;;  %v445_v43 = vpop.f32.mrf.mxu1 }
  0xe0   : > { %v370_v44 = vpop.f32.mrf.mxu0  ;;  %v447_v45 = vpop.f32.mrf.mxu1 }
  0xea   : > { %v374_v46 = vpop.f32.mrf.mxu0  ;;  %v451_v47 = vpop.f32.mrf.mxu1 }
  0xec   : > { %v376_v48 = vpop.f32.mrf.mxu0  ;;  %v453_v49 = vpop.f32.mrf.mxu1 }
  0xf1   : > { %v528_v50 = vpop.f32.mrf.mxu0  ;;  %v605_v51 = vpop.f32.mrf.mxu1 }
  0xf2   : > { %v529_v57 = vadd.f32 %v528_v50, %v368_v42  ;;  %v606_v58 = vadd.f32 %v605_v51, %v445_v43 }
  0xf3   : > { %v530_v52 = vpop.f32.mrf.mxu0  ;;  %v607_v53 = vpop.f32.mrf.mxu1 }
  0xf4   : > { %v531_v0 = vadd.f32 %v530_v52, %v370_v44  ;;  %v608_v1 = vadd.f32 %v607_v53, %v447_v45 }
  0xf7   : > { %v534_v54 = vpop.f32.mrf.mxu0  ;;  %v611_v9 = vpop.f32.mrf.mxu1 }
  0xf8   : > { %v535_v6 = vadd.f32 %v534_v54, %v374_v46  ;;  %v612_v7 = vadd.f32 %v611_v9, %v451_v47 }
  0xf9   : > { %v536_v55 = vpop.f32.mrf.mxu0  ;;  %v613_v56 = vpop.f32.mrf.mxu1 }
  0xfa   : > { %v537_v17 = vadd.f32 %v536_v55, %v376_v48  ;;  %v614_v18 = vadd.f32 %v613_v56, %v453_v49 }
 0x105   : > { %v723_v59 = vpop.f32.mrf.mxu0  ;;  %v800_v60 = vpop.f32.mrf.mxu1 }
 0x106   : > { %v811_v2 = vadd.f32 %v723_v59, %v529_v57  ;;  %v813_v3 = vadd.f32 %v800_v60, %v606_v58 }
 0x107   : > { %v725_v4 = vpop.f32.mrf.mxu0  ;;  %v802_v5 = vpop.f32.mrf.mxu1 }
 0x108   : > { %819 = vst [vmem:[%s1546_s25] sm:$0xff] %v811_v2  ;;  %821 = vst [vmem:[%s1546_s25 + $0x10] sm:$0xff] %v813_v3  ;;  %v812_v8 = vadd.f32 %v725_v4, %v531_v0  ;;  %v814_v10 = vadd.f32 %v802_v5, %v608_v1  ;;  %v889_v19 = vmul.f32 %v811_v2, %v811_v2 }
 0x109   : > { %v729_v11 = vpop.f32.mrf.mxu0  ;;  %v806_v12 = vpop.f32.mrf.mxu1  ;;  %v891_v20 = vmul.f32 %v813_v3, %v813_v3 }
 0x10a   : > { %820 = vst [vmem:[%s1546_s25 + $0x8] sm:$0xff] %v812_v8  ;;  %822 = vst [vmem:[%s1546_s25 + $0x18] sm:$0xff] %v814_v10  ;;  %v815_v13 = vadd.f32 %v729_v11, %v535_v6  ;;  %v817_v14 = vadd.f32 %v806_v12, %v612_v7  ;;  %v890_v27 = vmul.f32 %v812_v8, %v812_v8 }
 0x10b   : > { %v731_v21 = vpop.f32.mrf.mxu0  ;;  %v808_v22 = vpop.f32.mrf.mxu1  ;;  %v892_v28 = vmul.f32 %v814_v10, %v814_v10 }
 0x10c   : > { %823 = vst [vmem:[%s1546_s25 + $0x20] sm:$0xff] %v815_v13  ;;  %v827_v23 = vadd.f32 %v815_v13, %v811_v2  ;;  %v893_v24 = vmul.f32 %v815_v13, %v815_v13  ;;  %825 = vst [vmem:[%s1546_s25 + $0x30] sm:$0xff] %v817_v14  ;;  %v841_v25 = vadd.f32 %v817_v14, %v813_v3 }
 0x10d   : > { %v895_v26 = vmul.f32 %v817_v14, %v817_v14  ;;  %v816_v29 = vadd.f32 %v731_v21, %v537_v17  ;;  %v818_v30 = vadd.f32 %v808_v22, %v614_v18 }
 0x10e   : > { %v828_v31 = vrot.slane %v827_v23, 4  ;;  %v897_v32 = vadd.f32 %v893_v24, %v889_v19  ;;  %v842_v33 = vrot.slane %v841_v25, 4  ;;  %v866_v19 = vsub.s32 %v863_v15, %v1556_v16 }
 0x10f   : > { %v911_v34 = vadd.f32 %v895_v26, %v891_v20  ;;  %824 = vst [vmem:[%s1546_s25 + $0x28] sm:$0xff] %v816_v29  ;;  %v834_v35 = vadd.f32 %v816_v29, %v812_v8  ;;  %v894_v36 = vmul.f32 %v816_v29, %v816_v29  ;;  %826 = vst [vmem:[%s1546_s25 + $0x38] sm:$0xff] %v818_v30 }
 0x110   : > { %v848_v37 = vadd.f32 %v818_v30, %v814_v10  ;;  %v896_v38 = vmul.f32 %v818_v30, %v818_v30  ;;  %v829_v39 = vadd.f32 %v828_v31, %v827_v23  ;;  %v898_v40 = vrot.slane %v897_v32, 4 }
 0x111   : > { %v843_v41 = vadd.f32 %v842_v33, %v841_v25  ;;  %v912_v42 = vrot.slane %v911_v34, 4  ;;  %v835_v43 = vrot.slane %v834_v35, 4  ;;  %v904_v44 = vadd.f32 %v894_v36, %v890_v27 }
 0x112   : > { %v849_v45 = vrot.slane %v848_v37, 4  ;;  %v918_v46 = vadd.f32 %v896_v38, %v892_v28  ;;  %v830_v47 = vrot.slane %v829_v39, 2  ;;  %v899_v48 = vadd.f32 %v898_v40, %v897_v32 }
 0x113   : > { %v844_v49 = vrot.slane %v843_v41, 2  ;;  %v913_v50 = vadd.f32 %v912_v42, %v911_v34  ;;  %v836_v51 = vadd.f32 %v835_v43, %v834_v35  ;;  %v905_v52 = vrot.slane %v904_v44, 4 }
 0x114   : > { %v850_v53 = vadd.f32 %v849_v45, %v848_v37  ;;  %v919_v54 = vrot.slane %v918_v46, 4  ;;  %v831_v9 = vadd.f32 %v830_v47, %v829_v39  ;;  %v900_v55 = vrot.slane %v899_v48, 2 }
 0x115   : > { %v845_v56 = vadd.f32 %v844_v49, %v843_v41  ;;  %v914_v57 = vrot.slane %v913_v50, 2  ;;  %v837_v58 = vrot.slane %v836_v51, 2  ;;  %v906_v59 = vadd.f32 %v905_v52, %v904_v44 }
 0x116   : > { %v851_v60 = vrot.slane %v850_v53, 2  ;;  %v920_v61 = vadd.f32 %v919_v54, %v918_v46  ;;  %v832_v0 = vrot.slane %v831_v9, 1  ;;  %v901_v1 = vadd.f32 %v900_v55, %v899_v48 }
 0x117   : > { %v846_v2 = vrot.slane %v845_v56, 1  ;;  %v915_v3 = vadd.f32 %v914_v57, %v913_v50  ;;  %v838_v4 = vadd.f32 %v837_v58, %v836_v51  ;;  %v907_v5 = vrot.slane %v906_v59, 2 }
 0x118   : > { %v852_v6 = vadd.f32 %v851_v60, %v850_v53  ;;  %v921_v7 = vrot.slane %v920_v61, 2  ;;  %v902_v8 = vrot.slane %v901_v1, 1  ;;  %v833_v17 = vadd.f32 %v832_v0, %v831_v9 }
 0x119   : > { %v916_v10 = vrot.slane %v915_v3, 1  ;;  %v839_v11 = vrot.slane %v838_v4, 1  ;;  %v908_v12 = vadd.f32 %v907_v5, %v906_v59  ;;  %v847_v18 = vadd.f32 %v846_v2, %v845_v56 }
 0x11a   : > { %v853_v13 = vrot.slane %v852_v6, 1  ;;  %v922_v14 = vadd.f32 %v921_v7, %v920_v61  ;;  %v903_v24 = vadd.f32 %v902_v8, %v901_v1 }
 0x11b   : > { %v840_v20 = vadd.f32 %v839_v11, %v838_v4  ;;  %v909_v21 = vrot.slane %v908_v12, 1  ;;  %v917_v25 = vadd.f32 %v916_v10, %v915_v3 }
 0x11c   : > { %v854_v22 = vadd.f32 %v853_v13, %v852_v6  ;;  %v923_v23 = vrot.slane %v922_v14, 1 }
 0x11d   : > { %v859_v26 = vcombine.low %v833_v17, %v840_v20  ;;  %v910_v27 = vadd.f32 %v909_v21, %v908_v12 }
 0x11e   : > { %v860_v28 = vcombine.low %v847_v18, %v854_v22  ;;  %v924_v29 = vadd.f32 %v923_v23, %v922_v14 }
 0x11f   : > { %v867_v30 = vrot.slane %v859_v26, %v866_v19  ;;  %v929_v31 = vcombine.low %v903_v24, %v910_v27 }
 0x120   : > { %v874_v32 = vrot.slane %v860_v28, %v866_v19  ;;  %v930_v33 = vcombine.low %v917_v25, %v924_v29 }
 0x121   : > { %v937_v34 = vrot.slane %v929_v31, %v866_v19 }
 0x122   : > { %v875_v35 = vcombine.low %v867_v30, %v874_v32  ;;  %v944_v36 = vrot.slane %v930_v33, %v866_v19 }
 0x124   : > { %v882_v62 = vrot.slane %v875_v35, %v866_v19  ;;  %v945_v15 = vcombine.low %v937_v34, %v944_v36 }
 0x126   : > { %888 = vst.msk [vmem:[%s214_s29] sm:$0xf] %vm886_vm2, %v882_v62  ;;  %v952_v16 = vrot.slane %v945_v15, %v866_v19 }
 0x128   : > { %954 = vst.msk [vmem:[%s218_s10] sm:$0xf] %vm886_vm2, %v952_v16 }
 0x129 PF: > { %s15_s15 = sadd.s32 1, %s1179_s15  }
 0x12a   : > { %p12_p4 = scmp.ge.s32.totalorder %s15_s15, 4  }
 0x12c   :  { %14 = sbr.rel (!%p12_p4) target bundleno = 1 (0x1), region = 84 }

// kernel: up_conv_forward.3
= control target key start
LH: loop header
LB: loop body
LE: loop exit
PB: predicated region body
PF: predicated region fallthrough
CT: control target
= control target key end

     0   :  { %s598_s12 = smov 0   ;;  %s600_s13 = smov 0   ;;  %s675_s0 = inlined_call_operand.vmem [shape: f32[2,16,512], index: 0, kind: input, shape index: {}]   ;;  %s676_s1 = inlined_call_operand.vmem [shape: f32[1,512], index: 1, kind: input, shape index: {}]   ;;  %s677_s2 = inlined_call_operand.vmem [shape: f32[1,512], index: 2, kind: input, shape index: {}]   ;;  %s678_s3 = inlined_call_operand.vmem [shape: f32[2,8,16,64], index: 3, kind: output, shape index: {}]  }
   0x1   :  { %s602_s14 = smov 0  }
   0x2 LB: > { %s25_s15 = sadd.s32 1, %s571_s13  ;;  %p505_p0 = scmp.ge.s32.totalorder %s575_s14, 1  ;;  %s575_s14 = sphi %s602_s14, %s13_s14   ;;  %s571_s13 = sphi %s600_s13, %s680_s13   ;;  %s567_s12 = sphi %s598_s12, %s679_s12  }
   0x3   : > { %p27_p1 = scmp.ge.s32.totalorder %s25_s15, 2  ;;  %p178_p2 = scmp.lt.s32.totalorder %s575_s14, 3 }
   0x5   : > { %s682_s15 = smov (%p27_p1, %s25_s15), 0  ;;  %p179_p3 = pnand %p505_p0, %p178_p2 }
   0x6   : > { %p220_p4 = scmp.lt.s32.totalorder (!%p179_p3), %s567_s12, 1  ;;  %s577_s28 = smov (!%p179_p3), 64  }
   0x7   : > { %182 = sbr.rel (%p179_p3) target bundleno = 154 (0x9a), region = 32 }
   0xc   : > { %v260_v0 = vlaneseq  ;;  %s684_s12 = smov (!%p220_p4, %s567_s12), 1  ;;  %v258_v2 = vld [vmem:[%s676_s1] sm:$0xf]  ;;  %vm326_vm0 = vcmask 523264  }
   0xd   : > { %v288_v3 = vld [vmem:[%s677_s2] sm:$0xf]  ;;  %s526_s20 = sshll.u32 %s684_s12, 6  ;;  %s527_s24 = sshll.u32 %s684_s12, 7 }
   0xe   : > { %v261_v1 = vshrl.u32 %v260_v0, 7  ;;  %s227_s23 = scalar_lea.vmem %s675_s0, %s526_s20  ;;  %s632_s27 = scalar_lea.vmem %s678_s3, %s527_s24 }
   0xf   : > { %v251_v8 = vld [vmem:[%s227_s23 + $0x8] sm:$0xff]  ;;  %v250_v11 = vld [vmem:[%s227_s23] sm:$0xff]  ;;  %v256_v16 = vld [vmem:[%s227_s23 + $0x30] sm:$0xff] }
  0x10   : > { %v266_v4 = vsub.s32 1, %v261_v1  ;;  %v262_v5 = vsub.s32 0, %v261_v1  ;;  %v270_v6 = vsub.s32 2, %v261_v1  ;;  %v274_v7 = vsub.s32 3, %v261_v1  ;;  %v255_v14 = vld [vmem:[%s227_s23 + $0x28] sm:$0xff]  ;;  %v254_v15 = vld [vmem:[%s227_s23 + $0x20] sm:$0xff] }
  0x11   : > { %v252_v19 = vld [vmem:[%s227_s23 + $0x10] sm:$0xff]  ;;  %v257_v26 = vld [vmem:[%s227_s23 + $0x38] sm:$0xff] }
  0x12   : > { %v267_v9 = vrot.slane %v258_v2, %v266_v4  ;;  %v297_v10 = vrot.slane %v288_v3, %v266_v4  ;;  %v263_v12 = vrot.slane %v258_v2, %v262_v5  ;;  %v293_v13 = vrot.slane %v288_v3, %v262_v5  ;;  %v253_v27 = vld [vmem:[%s227_s23 + $0x18] sm:$0xff] }
  0x13   : > { %v271_v17 = vrot.slane %v258_v2, %v270_v6  ;;  %v301_v18 = vrot.slane %v288_v3, %v270_v6  ;;  %v275_v20 = vrot.slane %v258_v2, %v274_v7  ;;  %v305_v21 = vrot.slane %v288_v3, %v274_v7 }
  0x14   : > { %v281_v22 = vmul.f32 %v267_v9, %v251_v8  ;;  %v280_v23 = vmul.f32 %v263_v12, %v250_v11  ;;  %v285_v24 = vmul.f32 %v267_v9, %v255_v14  ;;  %v284_v25 = vmul.f32 %v263_v12, %v254_v15 }
  0x15   : > { %v286_v28 = vmul.f32 %v271_v17, %v256_v16  ;;  %v282_v29 = vmul.f32 %v271_v17, %v252_v19  ;;  %v287_v30 = vmul.f32 %v275_v20, %v257_v26  ;;  %v283_v31 = vmul.f32 %v275_v20, %v253_v27 }
  0x16   : > { %v311_v32 = vadd.f32 %v297_v10, %v281_v22  ;;  %v310_v33 = vadd.f32 %v293_v13, %v280_v23  ;;  %v315_v34 = vadd.f32 %v297_v10, %v285_v24  ;;  %v314_v35 = vadd.f32 %v293_v13, %v284_v25 }
  0x17   : > { %v316_v36 = vadd.f32 %v301_v18, %v286_v28  ;;  %v312_v37 = vadd.f32 %v301_v18, %v282_v29  ;;  %v317_v38 = vadd.f32 %v305_v21, %v287_v30  ;;  %v313_v39 = vadd.f32 %v305_v21, %v283_v31 }
  0x18   : > { %v319_v40 = vmax.f32 %v311_v32, 0.0  ;;  %v318_v41 = vmax.f32 %v310_v33, 0.0  ;;  %v323_v42 = vmax.f32 %v315_v34, 0.0  ;;  %v322_v43 = vmax.f32 %v314_v35, 0.0 }
  0x19   : > { %v324_v44 = vmax.f32 %v316_v36, 0.0  ;;  %v320_v45 = vmax.f32 %v312_v37, 0.0  ;;  %v325_v46 = vmax.f32 %v317_v38, 0.0  ;;  %v321_v47 = vmax.f32 %v313_v39, 0.0 }
  0x1a   : > { %345 = vrot.lane.b32.xlu1 %v319_v40, %s577_s28  ;;  %512 = vst.msk [vmem:[%s632_s27 + $0x20] sm:$0xff] %vm326_vm0, %v319_v40  ;;  %331 = vrot.lane.b32.xlu0 %v318_v41, %s577_s28  ;;  %327 = vst.msk [vmem:[%s632_s27] sm:$0xff] %vm326_vm0, %v318_v41 }
  0x1b   : > { %513 = vst.msk [vmem:[%s632_s27 + $0x28] sm:$0xff] %vm326_vm0, %v323_v42  ;;  %328 = vst.msk [vmem:[%s632_s27 + $0x8] sm:$0xff] %vm326_vm0, %v322_v43 }
  0x1c   : > { %517 = vst.msk [vmem:[%s632_s27 + $0x48] sm:$0xff] %vm326_vm0, %v324_v44  ;;  %516 = vst.msk [vmem:[%s632_s27 + $0x40] sm:$0xff] %vm326_vm0, %v320_v45 }
  0x1d   : > { %521 = vst.msk [vmem:[%s632_s27 + $0x68] sm:$0xff] %vm326_vm0, %v325_v46  ;;  %520 = vst.msk [vmem:[%s632_s27 + $0x60] sm:$0xff] %vm326_vm0, %v321_v47 }
  0x1e   : > { %347 = vrot.lane.b32.xlu1 %v323_v42, %s577_s28  ;;  %333 = vrot.lane.b32.xlu0 %v322_v43, %s577_s28 }
  0x22   : > { %361 = vrot.lane.b32.xlu1 %v324_v44, %s577_s28  ;;  %359 = vrot.lane.b32.xlu0 %v320_v45, %s577_s28 }
  0x26   : > { %375 = vrot.lane.b32.xlu1 %v325_v46, %s577_s28  ;;  %373 = vrot.lane.b32.xlu0 %v321_v47, %s577_s28 }
  0x8c   : > { %v346_v48 = vpop.permute.xlu1 %345  ;;  %v332_v49 = vpop.permute.xlu0 %331 }
  0x8d   : > { %514 = vst.msk [vmem:[%s632_s27 + $0x30] sm:$0xff] %vm326_vm0, %v346_v48  ;;  %510 = vst.msk [vmem:[%s632_s27 + $0x10] sm:$0xff] %vm326_vm0, %v332_v49 }
  0x90   : > { %v348_v50 = vpop.permute.xlu1 %347  ;;  %v334_v51 = vpop.permute.xlu0 %333 }
  0x91   : > { %515 = vst.msk [vmem:[%s632_s27 + $0x38] sm:$0xff] %vm326_vm0, %v348_v50  ;;  %511 = vst.msk [vmem:[%s632_s27 + $0x18] sm:$0xff] %vm326_vm0, %v334_v51 }
  0x94   : > { %v362_v52 = vpop.permute.xlu1 %361  ;;  %v360_v53 = vpop.permute.xlu0 %359 }
  0x95   : > { %519 = vst.msk [vmem:[%s632_s27 + $0x58] sm:$0xff] %vm326_vm0, %v362_v52  ;;  %518 = vst.msk [vmem:[%s632_s27 + $0x50] sm:$0xff] %vm326_vm0, %v360_v53 }
  0x98   : > { %v376_v54 = vpop.permute.xlu1 %375  ;;  %v374_v55 = vpop.permute.xlu0 %373 }
  0x99   : > { %523 = vst.msk [vmem:[%s632_s27 + $0x78] sm:$0xff] %vm326_vm0, %v376_v54  ;;  %522 = vst.msk [vmem:[%s632_s27 + $0x70] sm:$0xff] %vm326_vm0, %v374_v55 }
  0x9a PF: > { %s13_s14 = sadd.s32 1, %s575_s14   ;;  %s679_s12 = smov %s571_s13 }
  0x9b   : > { %p10_p5 = scmp.ge.s32.totalorder %s13_s14, 4   ;;  %s680_s13 = smov %s682_s15 }
  0x9d   :  { %12 = sbr.rel (!%p10_p5) target bundleno = 2 (0x2), region = 75 }

</bundles_post_ra>
